<compile_context>
chip_gen: v6e
topology: v6e:2x2x1
jax: 0.10.0
libtpu: 0.0.40
codegen_flags: <defaults>
</compile_context>

<pallas_src>
import jax
import jax.numpy as jnp
from jax.experimental import pallas as pl
from jax.experimental.pallas import tpu as pltpu

IN_FEATURES = 30
OUT_FEATURES = 1

MAX_TILE_B = 8192          # [R1] batch rows per grid step (multiple of 16)
_TILE_ALIGN = 16           # sublane alignment valid for both f32 (8) and bf16 (16)
_SPLIT_MIN_B = 2048        # [R5] above this, force >= 2 grid steps (both v7x TCs)
_VMEM_LIMIT_BYTES = 32 * 1024 * 1024   # [R2] safe on v5e/v6e (128 MiB phys) & v7x (64 MiB)


def _round_up(v, m):
    return ((v + m - 1) // m) * m


def _choose_tile(batch, max_tile_b):
    """Pick the per-step batch tile (multiple of 16, or the full batch)."""
    if batch <= _SPLIT_MIN_B:
        # [R8] single full-batch block; full-extent dims are always legal.
        return batch
    # [R5] at least two grid steps; cap by MAX_TILE_B ([R1]/[R2]).
    half = -(-batch // 2)
    return min(max_tile_b, _round_up(half, _TILE_ALIGN))


# --------------------------------------------------------------------------
# Primary kernel: lane-dense output  [R3]
# --------------------------------------------------------------------------
def _logreg_kernel_lane_dense(x_ref, w_ref, b_ref, o_ref):
    # x_ref: (tile_b, 30) VMEM (f32 or bf16)   w_ref: (1, 30) f32 VMEM (resident)
    # b_ref: (1, 1) f32 SMEM                   o_ref: (1, 1, tile_b) f32 VMEM
    x = x_ref[...].astype(jnp.float32)          # [R4] upcast; exact f32 math
    w = w_ref[...].astype(jnp.float32)
    b = b_ref[0, 0]
    # K=30, N=1 is degenerate for the MXU -> VPU multiply + XLU lane reduce.
    col = jnp.sum(x * w, axis=-1, keepdims=True)        # (tile_b, 1)
    # [R3] sublane -> lane relayout so the batch index lives in the lane dim;
    # bias add + sigmoid then run on the dense (1, tile_b) row (64 vregs, EUP).
    row = jnp.transpose(col)                             # (1, tile_b)
    o_ref[0] = jax.nn.sigmoid(row + b)


def _call_lane_dense(x, w, b, tile_b, num_tiles):
    batch = x.shape[0]
    flops = 2 * batch * IN_FEATURES + 4 * batch
    bytes_accessed = (x.size * x.dtype.itemsize
                      + 4 * num_tiles * tile_b
                      + 4 * (IN_FEATURES + 1))
    return pl.pallas_call(
        _logreg_kernel_lane_dense,
        out_shape=jax.ShapeDtypeStruct((num_tiles, 1, tile_b), jnp.float32),
        grid_spec=pltpu.PrefetchScalarGridSpec(
            num_scalar_prefetch=0,
            grid=(num_tiles,),
            in_specs=[
                # TODO(synk): consider pipeline_mode=pl.Buffered(3) here if a
                # trace still shows exposed x-DMA at step boundaries [R6].
                pl.BlockSpec((tile_b, IN_FEATURES), lambda i: (i, 0)),
                pl.BlockSpec((OUT_FEATURES, IN_FEATURES), lambda i: (0, 0)),
                pl.BlockSpec(memory_space=pltpu.MemorySpace.SMEM),
            ],
            out_specs=pl.BlockSpec((1, 1, tile_b), lambda i: (i, 0, 0)),
        ),
        compiler_params=pltpu.CompilerParams(
            dimension_semantics=("parallel",),
            vmem_limit_bytes=_VMEM_LIMIT_BYTES),
        cost_estimate=pl.CostEstimate(
            flops=flops, transcendentals=batch, bytes_accessed=bytes_accessed),
    )(x, w, b)


# --------------------------------------------------------------------------
# Fallback kernel: (tile_b, 1) column output (previously proven layout).
# Used only if the lane-dense variant fails to lower on this Mosaic build.
# --------------------------------------------------------------------------
def _logreg_kernel_column(x_ref, w_ref, b_ref, o_ref):
    x = x_ref[...].astype(jnp.float32)
    w = w_ref[...].astype(jnp.float32)
    b = b_ref[0, 0]
    y = jnp.sum(x * w, axis=-1, keepdims=True) + b       # (tile_b, 1)
    o_ref[...] = jax.nn.sigmoid(y)


def _call_column(x, w, b, tile_b, num_tiles):
    batch = x.shape[0]
    flops = 2 * batch * IN_FEATURES + 4 * batch
    bytes_accessed = (x.size * x.dtype.itemsize
                      + 4 * batch + 4 * (IN_FEATURES + 1))
    return pl.pallas_call(
        _logreg_kernel_column,
        out_shape=jax.ShapeDtypeStruct((batch, OUT_FEATURES), jnp.float32),
        grid_spec=pltpu.PrefetchScalarGridSpec(
            num_scalar_prefetch=0,
            grid=(num_tiles,),
            in_specs=[
                pl.BlockSpec((tile_b, IN_FEATURES), lambda i: (i, 0)),
                pl.BlockSpec((OUT_FEATURES, IN_FEATURES), lambda i: (0, 0)),
                pl.BlockSpec(memory_space=pltpu.MemorySpace.SMEM),
            ],
            out_specs=pl.BlockSpec((tile_b, OUT_FEATURES), lambda i: (i, 0)),
        ),
        compiler_params=pltpu.CompilerParams(
            dimension_semantics=("parallel",),
            vmem_limit_bytes=_VMEM_LIMIT_BYTES),
        cost_estimate=pl.CostEstimate(
            flops=flops, transcendentals=batch, bytes_accessed=bytes_accessed),
    )(x, w, b)


# --------------------------------------------------------------------------
# Wrapper
# --------------------------------------------------------------------------
def logistic_regression_forward(x, weight, bias, *, max_tile_b=MAX_TILE_B):
    """x: (B, 30) f32 or bf16; weight: (1, 30) torch layout; bias: (1,).

    Returns sigmoid(x @ weight.T + bias) as (B, 1) float32.
    """
    if x.ndim != 2 or x.shape[1] != IN_FEATURES:
        raise ValueError(f"expected x of shape (B, {IN_FEATURES}), got {x.shape}")
    batch = x.shape[0]

    # [R4] keep bf16 inputs bf16 through the DMA (halves HBM read traffic);
    # anything else is promoted to f32.  Params stay f32 (negligible traffic).
    if x.dtype != jnp.float32 and x.dtype != jnp.bfloat16:
        x = x.astype(jnp.float32)
    w = jnp.asarray(weight, jnp.float32).reshape(OUT_FEATURES, IN_FEATURES)
    b = jnp.asarray(bias, jnp.float32).reshape(1, 1)

    tile_b = _choose_tile(batch, max_tile_b)
    num_tiles = pl.cdiv(batch, tile_b)

    try:
        out = _call_lane_dense(x, w, b, tile_b, num_tiles)   # (num_tiles, 1, tile_b)
        # [R3] last tile may contain padded/garbage lanes -> slice back to B rows.
        return out.reshape(-1)[:batch].reshape(batch, OUT_FEATURES)
    except Exception:
        # Portability fallback: proven column-output layout (same math, same
        # tiling), used only if the in-kernel column->row relayout cannot be
        # lowered by this Mosaic build.
        return _call_column(x, w, b, tile_b, num_tiles)


def _reference(x, weight, bias):
    """Exact-f32 elementwise reference (avoids MXU default-precision effects)."""
    xf = x.astype(jnp.float32)
    wf = jnp.asarray(weight, jnp.float32).reshape(OUT_FEATURES, IN_FEATURES)
    bf = jnp.asarray(bias, jnp.float32)
    logits = jnp.sum(xf * wf[0], axis=-1, keepdims=True) + bf
    return jax.nn.sigmoid(logits)


if __name__ == "__main__":
    key = jax.random.PRNGKey(0)
    kx, kw, kb, kx2, kx3 = jax.random.split(key, 5)

    # nn.Linear(30, 1)-style parameters: U(-1/sqrt(30), 1/sqrt(30)).
    bound = float(1.0 / (IN_FEATURES ** 0.5))
    weight = jax.random.uniform(kw, (OUT_FEATURES, IN_FEATURES),
                                minval=-bound, maxval=bound, dtype=jnp.float32)
    bias = jax.random.uniform(kb, (OUT_FEATURES,),
                              minval=-bound, maxval=bound, dtype=jnp.float32)

    # 1) Small batch: single full-batch block.
    x1 = jax.random.normal(kx, (8, IN_FEATURES), dtype=jnp.float32)
    out1 = jax.block_until_ready(logistic_regression_forward(x1, weight, bias))
    ref1 = _reference(x1, weight, bias)
    assert out1.shape == (8, OUT_FEATURES)
    assert jnp.allclose(out1, ref1, atol=1e-5, rtol=1e-5)

    # 2) Moderate batch: exercises the 2-step split ([R5]) + partial last tile.
    x2 = jax.random.normal(kx2, (2600, IN_FEATURES), dtype=jnp.float32)
    out2 = jax.block_until_ready(logistic_regression_forward(x2, weight, bias))
    ref2 = _reference(x2, weight, bias)
    assert out2.shape == (2600, OUT_FEATURES)
    assert jnp.allclose(out2, ref2, atol=1e-5, rtol=1e-5)

    # 3) Large batch: exercises MAX_TILE_B tiles + tail slicing ([R1]/[R3]).
    x3 = jax.random.normal(kx3, (20000, IN_FEATURES), dtype=jnp.float32)
    out3 = jax.block_until_ready(logistic_regression_forward(x3, weight, bias))
    ref3 = _reference(x3, weight, bias)
    assert out3.shape == (20000, OUT_FEATURES)
    assert jnp.allclose(out3, ref3, atol=1e-5, rtol=1e-5)

    # 4) bf16 input path ([R4]): kernel upcasts to f32, so it matches the
    #    reference computed from the bf16-rounded inputs to f32 accuracy.
    x4 = x2.astype(jnp.bfloat16)
    out4 = jax.block_until_ready(logistic_regression_forward(x4, weight, bias))
    ref4 = _reference(x4, weight, bias)
    assert out4.shape == (2600, OUT_FEATURES)
    assert jnp.allclose(out4, ref4, atol=1e-5, rtol=1e-5)

    print("KERNEL_OK")
</pallas_src>

<mosaic_0001>
module attributes {stable_mosaic.version = 11 : i64} {
  func.func @_logreg_kernel_lane_dense(%arg0: i32, %arg1: memref<8x30xf32, #tpu.memory_space<vmem>>, %arg2: memref<1x30xf32, #tpu.memory_space<vmem>>, %arg3: memref<1x1xf32, #tpu.memory_space<smem>>, %arg4: memref<1x1x8xf32, #tpu.memory_space<vmem>>) attributes {dimension_semantics = [#tpu.dimension_semantics<parallel>], iteration_bounds = array<i64: 1>, scalar_prefetch = 0 : i64, scratch_operands = 0 : i64, tpu.core_type = #tpu.core_type<tc>, window_params = [{transform_indices = @transform_0, window_bounds = array<i64: 8, 30>}, {pipeline_mode = #tpu.pipeline_mode<synchronous>, transform_indices = @transform_1, window_bounds = array<i64: 1, 30>}, {transform_indices = @transform_2, window_bounds = array<i64: 1, 1>}, {transform_indices = @transform_3, window_bounds = array<i64: 1, 1, 8>}]} {
    %c0 = arith.constant 0 : index
    %c0_0 = arith.constant 0 : index
    %0 = vector.load %arg1[%c0, %c0_0] : memref<8x30xf32, #tpu.memory_space<vmem>>, vector<8x30xf32>
    %c0_1 = arith.constant 0 : index
    %c0_2 = arith.constant 0 : index
    %1 = vector.load %arg2[%c0_1, %c0_2] : memref<1x30xf32, #tpu.memory_space<vmem>>, vector<1x30xf32>
    %c0_3 = arith.constant 0 : index
    %c0_4 = arith.constant 0 : index
    %2 = memref.load %arg3[%c0_3, %c0_4] : memref<1x1xf32, #tpu.memory_space<smem>>
    %3 = vector.broadcast %1 : vector<1x30xf32> to vector<8x30xf32>
    %4 = arith.mulf %0, %3 : vector<8x30xf32>
    %cst = arith.constant dense<0.000000e+00> : vector<8xf32>
    %5 = vector.multi_reduction <add>, %4, %cst [1] : vector<8x30xf32> to vector<8xf32>
    %6 = vector.shape_cast %5 : vector<8xf32> to vector<8x1xf32>
    %7 = tpu.transpose %6, [1, 0] : vector<8x1xf32> -> vector<1x8xf32>
    %8 = vector.broadcast %2 : f32 to vector<1x8xf32>
    %9 = arith.addf %7, %8 : vector<1x8xf32>
    %10 = arith.negf %9 : vector<1x8xf32>
    %11 = math.exp %10 : vector<1x8xf32>
    %cst_5 = arith.constant 1.000000e+00 : f32
    %12 = vector.broadcast %cst_5 : f32 to vector<1x8xf32>
    %13 = arith.addf %12, %11 : vector<1x8xf32>
    %14 = arith.divf %12, %13 : vector<1x8xf32>
    %c0_6 = arith.constant 0 : index
    %c0_7 = arith.constant 0 : index
    %c0_8 = arith.constant 0 : index
    %15 = vector.load %arg4[%c0_6, %c0_7, %c0_8] : memref<1x1x8xf32, #tpu.memory_space<vmem>>, vector<1x1x8xf32>
    %16 = vector.shape_cast %15 : vector<1x1x8xf32> to vector<1x8xf32>
    %17 = vector.shape_cast %14 : vector<1x8xf32> to vector<1x1x8xf32>
    tpu.vector_store %arg4[%c0_6, %c0_7, %c0_8], %17 {strides = array<i32>} : memref<1x1x8xf32, #tpu.memory_space<vmem>>, vector<1x1x8xf32>,
    return
  }
  func.func @transform_0(%arg0: i32) -> (i32, i32) {
    %c0_i32 = arith.constant 0 : i32
    %c0_i32_0 = arith.constant 0 : i32
    return %arg0, %c0_i32 : i32, i32
  }
  func.func @transform_1(%arg0: i32) -> (i32, i32) {
    %c0_i32 = arith.constant 0 : i32
    %c0_i32_0 = arith.constant 0 : i32
    %c0_i32_1 = arith.constant 0 : i32
    return %c0_i32, %c0_i32_0 : i32, i32
  }
  func.func @transform_2(%arg0: i32) -> (i32, i32) {
    %c0_i32 = arith.constant 0 : i32
    %c0_i32_0 = arith.constant 0 : i32
    %c0_i32_1 = arith.constant 0 : i32
    return %c0_i32, %c0_i32_0 : i32, i32
  }
  func.func @transform_3(%arg0: i32) -> (i32, i32, i32) {
    %c0_i32 = arith.constant 0 : i32
    %c0_i32_0 = arith.constant 0 : i32
    %c0_i32_1 = arith.constant 0 : i32
    return %arg0, %c0_i32, %c0_i32_0 : i32, i32, i32
  }
}

module attributes {stable_mosaic.version = 11 : i64} {
  func.func @_logreg_kernel_column(%arg0: i32, %arg1: memref<8x30xf32, #tpu.memory_space<vmem>>, %arg2: memref<1x30xf32, #tpu.memory_space<vmem>>, %arg3: memref<1x1xf32, #tpu.memory_space<smem>>, %arg4: memref<8x1xf32, #tpu.memory_space<vmem>>) attributes {dimension_semantics = [#tpu.dimension_semantics<parallel>], iteration_bounds = array<i64: 1>, scalar_prefetch = 0 : i64, scratch_operands = 0 : i64, tpu.core_type = #tpu.core_type<tc>, window_params = [{transform_indices = @transform_0, window_bounds = array<i64: 8, 30>}, {pipeline_mode = #tpu.pipeline_mode<synchronous>, transform_indices = @transform_1, window_bounds = array<i64: 1, 30>}, {transform_indices = @transform_2, window_bounds = array<i64: 1, 1>}, {transform_indices = @transform_3, window_bounds = array<i64: 8, 1>}]} {
    %c0 = arith.constant 0 : index
    %c0_0 = arith.constant 0 : index
    %0 = vector.load %arg1[%c0, %c0_0] : memref<8x30xf32, #tpu.memory_space<vmem>>, vector<8x30xf32>
    %c0_1 = arith.constant 0 : index
    %c0_2 = arith.constant 0 : index
    %1 = vector.load %arg2[%c0_1, %c0_2] : memref<1x30xf32, #tpu.memory_space<vmem>>, vector<1x30xf32>
    %c0_3 = arith.constant 0 : index
    %c0_4 = arith.constant 0 : index
    %2 = memref.load %arg3[%c0_3, %c0_4] : memref<1x1xf32, #tpu.memory_space<smem>>
    %3 = vector.broadcast %1 : vector<1x30xf32> to vector<8x30xf32>
    %4 = arith.mulf %0, %3 : vector<8x30xf32>
    %cst = arith.constant dense<0.000000e+00> : vector<8xf32>
    %5 = vector.multi_reduction <add>, %4, %cst [1] : vector<8x30xf32> to vector<8xf32>
    %6 = vector.shape_cast %5 : vector<8xf32> to vector<8x1xf32>
    %7 = vector.broadcast %2 : f32 to vector<8x1xf32>
    %8 = arith.addf %6, %7 : vector<8x1xf32>
    %9 = arith.negf %8 : vector<8x1xf32>
    %10 = math.exp %9 : vector<8x1xf32>
    %cst_5 = arith.constant 1.000000e+00 : f32
    %11 = vector.broadcast %cst_5 : f32 to vector<8x1xf32>
    %12 = arith.addf %11, %10 : vector<8x1xf32>
    %13 = arith.divf %11, %12 : vector<8x1xf32>
    %c0_6 = arith.constant 0 : index
    %c0_7 = arith.constant 0 : index
    %14 = vector.load %arg4[%c0_6, %c0_7] : memref<8x1xf32, #tpu.memory_space<vmem>>, vector<8x1xf32>
    tpu.vector_store %arg4[%c0_6, %c0_7], %13 {strides = array<i32>} : memref<8x1xf32, #tpu.memory_space<vmem>>, vector<8x1xf32>,
    return
  }
  func.func @transform_0(%arg0: i32) -> (i32, i32) {
    %c0_i32 = arith.constant 0 : i32
    %c0_i32_0 = arith.constant 0 : i32
    return %arg0, %c0_i32 : i32, i32
  }
  func.func @transform_1(%arg0: i32) -> (i32, i32) {
    %c0_i32 = arith.constant 0 : i32
    %c0_i32_0 = arith.constant 0 : i32
    %c0_i32_1 = arith.constant 0 : i32
    return %c0_i32, %c0_i32_0 : i32, i32
  }
  func.func @transform_2(%arg0: i32) -> (i32, i32) {
    %c0_i32 = arith.constant 0 : i32
    %c0_i32_0 = arith.constant 0 : i32
    %c0_i32_1 = arith.constant 0 : i32
    return %c0_i32, %c0_i32_0 : i32, i32
  }
  func.func @transform_3(%arg0: i32) -> (i32, i32) {
    %c0_i32 = arith.constant 0 : i32
    %c0_i32_0 = arith.constant 0 : i32
    return %arg0, %c0_i32 : i32, i32
  }
}

</mosaic_0001>

<bundles_post_ra>
// kernel: tpu_custom_call.1
= control target key start
LH: loop header
LB: loop body
LE: loop exit
PB: predicated region body
PF: predicated region fallthrough
CT: control target
= control target key end

     0   :  { %9 = vsyncpa [#allocation4], 0  ;;  %s186_s0 = inlined_call_operand.hbm [shape: f32[8,30], index: 0, kind: input, shape index: {}]   ;;  %s187_s1 = inlined_call_operand.vmem [shape: f32[1,30], index: 1, kind: input, shape index: {}]   ;;  %s188_s2 = inlined_call_operand.<no memory space> [shape: f32[1,1], index: 2, kind: input, shape index: {}]   ;;  %s189_s3 = inlined_call_operand.hbm [shape: f32[1,1,8], index: 3, kind: output, shape index: {}]  }
   0x1   :  { %10 = vsyncpa [#allocation5], 0  ;;  %s152_s12 = smov [#allocation3]  }
   0x2   :  { %s17_s13 = sshll.u32 %s152_s12, 4  ;;  %s18_s13 = int_to_ptr.vmem [resolvable:$true] %s17_s13 }
   0x3   :  { %s116_s14 = scalar_lea.vmem %s18_s13, 128  ;;  %p121_p1 = scmp.lt.s32.totalorder %s18_s13, %s18_s13 }
   0x4   :  { %p117_p0 = scmp.ne.s32.totalorder %s18_s13, %s116_s14  ;;  %p122_p2 = scmp.lt.s32.totalorder %s116_s14, %s116_s14 }
   0x6   :  { %p123_p3 = por %p122_p2, %p121_p1 }
   0x8   :  { %p124_p4 = pnand %p123_p3, %p117_p0 }
   0xa   :  { %127 = shalt.err (!%p124_p4)
}
   0xb   :  { %20 = dma.hbm_to_vmem [thread:$0]  %s186_s0, 128, %s18_s13, [#allocation4]  }
   0xc   :  { %148 = dma.done.wait [#allocation4], 128  }
   0xd   :  { %149 = vsyncadd [#allocation4], 4294967168  ;;  %v28_v0 = vld [vmem:[#allocation3] sm:$0xff]  ;;  %vm38_vm0 = vcmask 244736   ;;  %v74_v5 = vstv %s188_s2  ;;  %s153_s0 = smov [#allocation6]   ;;  %vm82_vm1 = vcmask 57344  }
   0xe   :  { %v99_v1 = vld [vmem:[%s187_s1] ss:$0 sm:$0xff]  ;;  %s90_s21 = sshll.u32 %s153_s0, 4  ;;  %s91_s21 = int_to_ptr.vmem [resolvable:$true] %s90_s21 }
   0xf   :  { %v37_v2 = vmul.f32 %v99_v1, %v28_v0  ;;  %s128_s1 = scalar_lea.vmem %s91_s21, 16  ;;  %s132_s22 = scalar_lea.vmem %s91_s21, 32 }
  0x10   :  { %p129_p5 = scmp.ne.s32.totalorder %s91_s21, %s128_s1  ;;  %p133_p6 = scmp.lt.s32.totalorder %s91_s21, %s91_s21 }
  0x11   :  { %v39_v3 = vsel %vm38_vm0, %v37_v2, 0.0  ;;  %p134_p7 = scmp.lt.s32.totalorder %s132_s22, %s128_s1 }
  0x12   :  { %40 = vadd.xlane.f32.xlu0 %v39_v3 }
  0x13   :  { %p135_p8 = por %p134_p7, %p133_p6 }
  0x15   :  { %p136_p9 = pnand %p135_p8, %p129_p5 }
  0x9b   :  { %v41_v4 = vpop.xlane.xlu0 %40 }
  0x9c   :  { %42 = vxpose.xlu0.b32.start.end [1/1] (short) (narrow) %v41_v4, 8 }
 0x118   :  { %v58_v6 = vpop.trf.xlu0 }
 0x119   :  { %v75_v7 = vadd.f32 %v74_v5, %v58_v6 }
 0x11b   :  { %v100_v8 = vmul.f32 -1.442695, %v75_v7 }
 0x11d   :  { %104 = vpow2.f32 %v100_v8 }
 0x12a   :  { %v105_v9 = vpop.eup %104 }
 0x12b   :  { %v79_v10 = vadd.f32 1.0, %v105_v9 }
 0x12d   :  { %106 = vrcp.f32 %v79_v10 }
 0x13a   :  { %v107_v11 = vpop.eup %106 }
 0x13b   :  { %83 = vst.msk [vmem:[#allocation6] sm:$0x1] %vm82_vm1, %v107_v11 }
 0x13c   :  { %139 = shalt.err (!%p136_p9)
}
 0x13d   :  { %93 = dma.vmem_to_hbm [thread:$0]  %s91_s21, 16, %s189_s3, [#allocation5]  }
 0x13e   :  { %150 = dma.done.wait [#allocation5], 16  }
 0x13f   :  { %151 = vsyncadd [#allocation5], 4294967280 }
 0x140   :  { %97 = vsyncpa [#allocation4], 1 }
 0x141   :  { %98 = vsyncpa [#allocation5], 1 }

// kernel: tpu_custom_call.1
= control target key start
LH: loop header
LB: loop body
LE: loop exit
PB: predicated region body
PF: predicated region fallthrough
CT: control target
= control target key end

     0   :  { %9 = vsyncpa [#allocation4], 0  ;;  %s85_s12 = smov [#allocation3]   ;;  %s118_s0 = inlined_call_operand.hbm [shape: f32[8,30], index: 0, kind: input, shape index: {}]   ;;  %s119_s1 = inlined_call_operand.vmem [shape: f32[1,30], index: 1, kind: input, shape index: {}]   ;;  %s120_s2 = inlined_call_operand.<no memory space> [shape: f32[1,1], index: 2, kind: input, shape index: {}]   ;;  %s121_s3 = inlined_call_operand.vmem [shape: f32[8,1], index: 3, kind: output, shape index: {}]  }
   0x1   :  { %s16_s13 = sshll.u32 %s85_s12, 4  ;;  %s17_s13 = int_to_ptr.vmem [resolvable:$true] %s16_s13 }
   0x2   :  { %s71_s14 = scalar_lea.vmem %s17_s13, 128  ;;  %p76_p1 = scmp.lt.s32.totalorder %s17_s13, %s17_s13 }
   0x3   :  { %p72_p0 = scmp.ne.s32.totalorder %s17_s13, %s71_s14  ;;  %p77_p2 = scmp.lt.s32.totalorder %s71_s14, %s71_s14 }
   0x5   :  { %p78_p3 = por %p77_p2, %p76_p1 }
   0x7   :  { %p79_p4 = pnand %p78_p3, %p72_p0 }
   0x9   :  { %82 = shalt.err (!%p79_p4)
}
   0xa   :  { %19 = dma.hbm_to_vmem [thread:$0]  %s118_s0, 128, %s17_s13, [#allocation4]  }
   0xb   :  { %83 = dma.done.wait [#allocation4], 128  }
   0xc   :  { %84 = vsyncadd [#allocation4], 4294967168  ;;  %v27_v0 = vld [vmem:[#allocation3] sm:$0xff]  ;;  %vm37_vm0 = vcmask 244736   ;;  %v41_v4 = vstv %s120_s2  ;;  %vm49_vm1 = vcmask 7168  }
   0xd   :  { %v56_v1 = vld [vmem:[%s119_s1] ss:$0 sm:$0xff] }
   0xe   :  { %v36_v2 = vmul.f32 %v56_v1, %v27_v0 }
  0x10   :  { %v38_v3 = vsel %vm37_vm0, %v36_v2, 0.0 }
  0x11   :  { %39 = vadd.xlane.f32.xlu0 %v38_v3 }
  0x9a   :  { %v40_v5 = vpop.xlane.xlu0 %39 }
  0x9b   :  { %v42_v6 = vadd.f32 %v41_v4, %v40_v5 }
  0x9d   :  { %v57_v7 = vmul.f32 -1.442695, %v42_v6 }
  0x9f   :  { %59 = vpow2.f32 %v57_v7 }
  0xac   :  { %v60_v8 = vpop.eup %59 }
  0xad   :  { %v46_v9 = vadd.f32 1.0, %v60_v8 }
  0xaf   :  { %61 = vrcp.f32 %v46_v9 }
  0xbc   :  { %v62_v10 = vpop.eup %61 }
  0xbd   :  { %50 = vst.msk [vmem:[%s121_s3] sm:$0xff] %vm49_vm1, %v62_v10 }
  0xbe   :  { %55 = vsyncpa [#allocation4], 1 }

</bundles_post_ra>
